<compile_context>
chip_gen: v7x
topology: tpu7x:2x2x1
jax: 0.10.0
libtpu: 0.0.40
codegen_flags: <defaults>
</compile_context>

<pallas_src>
import functools

import numpy as np
import jax
import jax.numpy as jnp
from jax.experimental import pallas as pl
from jax.experimental.pallas import tpu as pltpu

TAU_INV = 0.5  # 1 / tau, tau = 2.0


def _lif_step(mem_ref, inp, thr):
    """One LIF time step on a VMEM membrane ref.  Returns spikes (exactly 0/1).

    Charge: v = mem + (inp - mem)/tau == (mem + inp) * 0.5 for tau = 2.
    Fire: spike = v >= thr.  Hard reset to 0.
    """
    v = (mem_ref[...] + inp) * TAU_INV
    fired = v >= thr
    mem_ref[...] = jnp.where(fired, 0.0, v)
    return fired.astype(jnp.float32)


def ms_ssa_kernel(x_ref, wqk_ref, wp_ref, ones_red_ref, ones_bc_ref,
                  qk_bias_ref, v_scale_ref, v_bias_ref, p_bias_ref,
                  out_ref, vout_ref,
                  mem_sc, mem_qk, mem_v, mem_th):
    # grid = (G, T); t (axis 1) is the inner, sequential axis.
    t = pl.program_id(1)

    @pl.when(t == 0)
    def _():
        # New batch group: reset all LIF membrane potentials.
        mem_sc[...] = jnp.zeros_like(mem_sc)
        mem_qk[...] = jnp.zeros_like(mem_qk)
        mem_v[...] = jnp.zeros_like(mem_v)
        mem_th[...] = jnp.zeros_like(mem_th)

    C = x_ref.shape[0]                         # rows = channels, lanes = BG*N

    # shortcut_lif
    xs = _lif_step(mem_sc, x_ref[...], 1.0)    # (C, L), exactly 0/1

    # q & k 1x1 convs fused: one (2C,C)x(C,L) bf16 matmul (BN scale folded into
    # the weight rows), per-row BN bias, one shared LIF slab (same threshold).
    qk_pre = jnp.dot(wqk_ref[...], xs.astype(jnp.bfloat16),
                     preferred_element_type=jnp.float32) + qk_bias_ref[...]
    qk_s = _lif_step(mem_qk, qk_pre, 1.0)      # (2C, L)
    qs, ks = qk_s[:C], qk_s[C:]

    # v branch: BN only (the module has no v_conv), then v_lif.
    vs = _lif_step(mem_v, xs * v_scale_ref[...] + v_bias_ref[...], 1.0)

    # kv = sum over spatial N of (k*v), per (batch, channel).  Segmented lane
    # reduction as an exact bf16 matmul against a 0/1 matrix (k*v is 0/1 so
    # bf16 is exact; accumulation is f32), then talking_heads_lif on a tiny
    # (C, BG) membrane, then broadcast the 0/1 spikes back over the lanes with
    # another exact tiny matmul.
    kv_sum = jnp.dot((ks * vs).astype(jnp.bfloat16), ones_red_ref[...],
                     preferred_element_type=jnp.float32)           # (C, BG)
    kvs = _lif_step(mem_th, kv_sum, 0.5)                           # thr = 0.5
    kv_lane = jnp.dot(kvs.astype(jnp.bfloat16), ones_bc_ref[...],
                      preferred_element_type=jnp.float32)          # (C, L) 0/1

    attn = (qs * kv_lane).astype(jnp.bfloat16)                     # exactly 0/1

    # proj: 1x1 conv + BN (scale folded into weight, conv bias + BN bias folded
    # into the bias column).
    out = jnp.dot(wp_ref[...], attn,
                  preferred_element_type=jnp.float32) + p_bias_ref[...]

    out_ref[...] = out.astype(out_ref.dtype)
    vout_ref[...] = vs.astype(vout_ref.dtype)


def _bn_fold(gamma, beta, mean, var, eps=1e-5):
    scale = gamma / jnp.sqrt(var + eps)
    bias = beta - mean * scale
    return scale, bias


def fold_params(params):
    """Fold inference BN + proj bias; stack q|k; cast weights to bf16 (once)."""
    q_s, q_b = _bn_fold(*params["q_bn"])
    k_s, k_b = _bn_fold(*params["k_bn"])
    v_s, v_b = _bn_fold(*params["v_bn"])
    p_s, p_b = _bn_fold(*params["proj_bn"])
    # conv weights are (C_out, C_in); BN scale folds into output rows.
    wq = q_s[:, None] * params["wq"]
    wk = k_s[:, None] * params["wk"]
    wp = p_s[:, None] * params["wp"]
    return {
        "wqk": jnp.concatenate([wq, wk], axis=0).astype(jnp.bfloat16),  # (2C,C)
        "wp": wp.astype(jnp.bfloat16),                                   # (C,C)
        "qk_bias": jnp.concatenate([q_b, k_b])[:, None],                 # (2C,1)
        "v_scale": v_s[:, None],                                         # (C,1)
        "v_bias": v_b[:, None],
        "p_bias": (p_s * params["proj_bias"] + p_b)[:, None],
    }


@functools.partial(jax.jit,
                   static_argnames=("num_heads", "batch_groups", "core_parallel"))
def ms_ssa_conv_forward(x_tbchw, folded, num_heads, batch_groups=1,
                        core_parallel=False):
    """Forward of MS_SSA_Conv (inference, spike_mode='lif', dvs=False).

    Returns (x: (T,B,C,H,W) f32, v: (T,B,heads,N,C//heads) bf16 — v spikes are
    exactly 0/1, so callers may cast lazily if they need f32).
    """
    T, B, C, H, W = x_tbchw.shape
    N = H * W
    G = batch_groups
    assert B % G == 0 and C % num_heads == 0
    BG = B // G
    L = BG * N

    # Batch-on-lanes layout: (T,B,C,H,W) -> (T,G,C,BG*N).  One XLA transpose;
    # in-kernel vector ops / stores are then lane-dense and the matmuls use
    # native-shape weights.
    x = (x_tbchw.astype(jnp.float32)
         .reshape(T, G, BG, C, N)
         .transpose(0, 1, 3, 2, 4)
         .reshape(T, G, C, L))

    # Constant 0/1 segmented-sum / broadcast matrices (built in numpy -> baked
    # into the jaxpr as constants, no per-call compute).
    ones_red_np = np.zeros((L, BG), np.float32)
    for b in range(BG):
        ones_red_np[b * N:(b + 1) * N, b] = 1.0
    ones_red = jnp.asarray(ones_red_np, dtype=jnp.bfloat16)        # (L, BG)
    ones_bc = jnp.asarray(ones_red_np.T, dtype=jnp.bfloat16)       # (BG, L)

    # VMEM footprint estimate (double-buffered blocks + weights + membranes);
    # only raise the scoped limit when needed.  On v7x (64 MiB physical),
    # increase batch_groups until this stays comfortably below ~48 MiB.
    f32b, bf16b = 4, 2
    est = (2 * C * L * f32b            # x input block (double-buffered)
           + 2 * C * L * f32b          # x output block
           + 2 * C * L * bf16b         # v output block
           + 2 * 3 * C * C * bf16b     # wqk + wp
           + 2 * 2 * L * BG * bf16b    # ones_red + ones_bc
           + 4 * C * L * f32b          # membranes (shortcut + q|k + v)
           + C * BG * f32b)            # talking_heads membrane
    vmem_limit = None
    if est > 24 * (1 << 20):
        vmem_limit = int(min(2 * est, 64 * (1 << 20)))

    if core_parallel:
        # v7x: split the batch-group axis across the two TensorCores.
        dim_sem = (pltpu.CORE_PARALLEL, pltpu.ARBITRARY)
    else:
        dim_sem = ("parallel", "arbitrary")

    out_x, out_v = pl.pallas_call(
        ms_ssa_kernel,
        out_shape=(jax.ShapeDtypeStruct((T, G, C, L), jnp.float32),
                   jax.ShapeDtypeStruct((T, G, C, L), jnp.bfloat16)),
        grid_spec=pltpu.PrefetchScalarGridSpec(
            num_scalar_prefetch=0,
            grid=(G, T),
            in_specs=[
                pl.BlockSpec((None, None, C, L), lambda g, t: (t, g, 0, 0)),
                pl.BlockSpec((2 * C, C), lambda g, t: (0, 0)),
                pl.BlockSpec((C, C), lambda g, t: (0, 0)),
                pl.BlockSpec((L, BG), lambda g, t: (0, 0)),
                pl.BlockSpec((BG, L), lambda g, t: (0, 0)),
                pl.BlockSpec((2 * C, 1), lambda g, t: (0, 0)),
                pl.BlockSpec((C, 1), lambda g, t: (0, 0)),
                pl.BlockSpec((C, 1), lambda g, t: (0, 0)),
                pl.BlockSpec((C, 1), lambda g, t: (0, 0)),
            ],
            out_specs=[
                pl.BlockSpec((None, None, C, L), lambda g, t: (t, g, 0, 0)),
                pl.BlockSpec((None, None, C, L), lambda g, t: (t, g, 0, 0)),
            ],
            scratch_shapes=[
                pltpu.VMEM((C, L), jnp.float32),      # shortcut_lif membrane
                pltpu.VMEM((2 * C, L), jnp.float32),  # q_lif + k_lif membranes
                pltpu.VMEM((C, L), jnp.float32),      # v_lif membrane
                pltpu.VMEM((C, BG), jnp.float32),     # talking_heads_lif membrane
            ],
        ),
        compiler_params=pltpu.CompilerParams(
            dimension_semantics=dim_sem,
            vmem_limit_bytes=vmem_limit),
    )(x, folded["wqk"], folded["wp"], ones_red, ones_bc,
      folded["qk_bias"], folded["v_scale"], folded["v_bias"], folded["p_bias"])

    # Inverse layout transforms back to the module's output formats.
    x_out = (out_x.reshape(T, G, C, BG, N)
             .transpose(0, 1, 3, 2, 4)
             .reshape(T, B, C, H, W))
    ch = C // num_heads
    v_out = (out_v.reshape(T, G, num_heads, ch, BG, N)
             .transpose(0, 1, 4, 2, 5, 3)
             .reshape(T, B, num_heads, N, ch))
    return x_out, v_out


# ------------------------- pure-JAX reference ------------------------------
def _lif_scan(x_seq, thr):
    def step(v, xt):
        v = (v + xt) * TAU_INV          # same algebraic form as the kernel
        s = (v >= thr).astype(jnp.float32)
        v = jnp.where(v >= thr, 0.0, v)
        return v, s
    _, spikes = jax.lax.scan(step, jnp.zeros_like(x_seq[0]), x_seq)
    return spikes


def reference_forward(x_tbchw, folded):
    T, B, C, H, W = x_tbchw.shape
    x = x_tbchw.reshape(T, B, C, H * W).astype(jnp.float32)
    wqk = folded["wqk"].astype(jnp.float32)
    wq, wk = wqk[:C], wqk[C:]
    wp = folded["wp"].astype(jnp.float32)
    q_bias, k_bias = folded["qk_bias"][:C], folded["qk_bias"][C:]
    hi = jax.lax.Precision.HIGHEST

    xs = _lif_scan(x, 1.0)
    q_pre = jnp.einsum("oc,tbcn->tbon", wq, xs, precision=hi) + q_bias
    qs = _lif_scan(q_pre, 1.0)
    k_pre = jnp.einsum("oc,tbcn->tbon", wk, xs, precision=hi) + k_bias
    ks = _lif_scan(k_pre, 1.0)
    v_pre = xs * folded["v_scale"] + folded["v_bias"]
    vs = _lif_scan(v_pre, 1.0)
    kv = (ks * vs).sum(axis=-1, keepdims=True)
    kvs = _lif_scan(kv, 0.5)
    attn = qs * kvs
    out = jnp.einsum("oc,tbcn->tbon", wp, attn, precision=hi) + folded["p_bias"]
    return out, vs   # both (T, B, C, N)


if __name__ == "__main__":
    T, B, C, H, W = 4, 2, 32, 8, 8
    num_heads = 8
    N = H * W

    key = jax.random.PRNGKey(0)
    ks_ = jax.random.split(key, 16)

    def bn_params(k):
        k1, k2, k3, k4 = jax.random.split(k, 4)
        gamma = 1.0 + 0.1 * jax.random.normal(k1, (C,), jnp.float32)
        beta = 0.1 * jax.random.normal(k2, (C,), jnp.float32)
        mean = 0.1 * jax.random.normal(k3, (C,), jnp.float32)
        var = jax.random.uniform(k4, (C,), jnp.float32, 0.5, 1.5)
        return (gamma, beta, mean, var)

    params = {
        "wq": jax.random.normal(ks_[0], (C, C), jnp.float32) / jnp.sqrt(C),
        "wk": jax.random.normal(ks_[1], (C, C), jnp.float32) / jnp.sqrt(C),
        "wp": jax.random.normal(ks_[2], (C, C), jnp.float32) / jnp.sqrt(C),
        "proj_bias": 0.1 * jax.random.normal(ks_[3], (C,), jnp.float32),
        "q_bn": bn_params(ks_[4]),
        "k_bn": bn_params(ks_[5]),
        "v_bn": bn_params(ks_[6]),
        "proj_bn": bn_params(ks_[7]),
    }
    folded = fold_params(params)

    # positive-ish input so the LIF neurons actually spike
    x_in = jnp.abs(jax.random.normal(ks_[8], (T, B, C, H, W), jnp.float32)) * 2.0

    # batch_groups=1 / core_parallel=False for v5e/v6e (single TensorCore);
    # on v7x use batch_groups=2, core_parallel=True so both TCs get work.
    x_out, v_out = ms_ssa_conv_forward(x_in, folded, num_heads=num_heads,
                                       batch_groups=1, core_parallel=False)
    jax.block_until_ready((x_out, v_out))

    # correctness check against pure-JAX reference (same bf16-folded weights)
    ref_x, ref_v = reference_forward(x_in, folded)
    ref_x = ref_x.reshape(T, B, C, H, W)
    ref_v = ref_v.reshape(T, B, num_heads, C // num_heads, N).transpose(0, 1, 2, 4, 3)

    dx = jnp.abs(x_out - ref_x)
    dv = jnp.abs(v_out.astype(jnp.float32) - ref_v)
    # tolerate (at most) a vanishingly rare threshold-edge spike flip from
    # matmul accumulation-order differences, otherwise require close agreement.
    frac_bad = (jnp.mean((dx > 1e-3).astype(jnp.float32)) +
                jnp.mean((dv > 1e-3).astype(jnp.float32)))
    assert float(frac_bad) < 1e-3, f"mismatch fraction too high: {float(frac_bad)}"

    print("KERNEL_OK")
</pallas_src>

<mosaic_0001>
module attributes {stable_mosaic.version = 11 : i64} {
  func.func @ms_ssa_kernel(%arg0: i32, %arg1: i32, %arg2: memref<1x1x32x128xf32, #tpu.memory_space<vmem>>, %arg3: memref<64x32xbf16, #tpu.memory_space<vmem>>, %arg4: memref<32x32xbf16, #tpu.memory_space<vmem>>, %arg5: memref<128x2xbf16, #tpu.memory_space<vmem>>, %arg6: memref<2x128xbf16, #tpu.memory_space<vmem>>, %arg7: memref<64x1xf32, #tpu.memory_space<vmem>>, %arg8: memref<32x1xf32, #tpu.memory_space<vmem>>, %arg9: memref<32x1xf32, #tpu.memory_space<vmem>>, %arg10: memref<32x1xf32, #tpu.memory_space<vmem>>, %arg11: memref<1x1x32x128xf32, #tpu.memory_space<vmem>>, %arg12: memref<1x1x32x128xbf16, #tpu.memory_space<vmem>>, %arg13: memref<32x128xf32, #tpu.memory_space<vmem>>, %arg14: memref<64x128xf32, #tpu.memory_space<vmem>>, %arg15: memref<32x128xf32, #tpu.memory_space<vmem>>, %arg16: memref<32x2xf32, #tpu.memory_space<vmem>>) attributes {dimension_semantics = [#tpu.dimension_semantics<parallel>, #tpu.dimension_semantics<arbitrary>], iteration_bounds = array<i64: 1, 4>, scalar_prefetch = 0 : i64, scratch_operands = 4 : i64, tpu.core_type = #tpu.core_type<tc>, window_params = [{transform_indices = @transform_0, window_bounds = array<i64: 1, 1, 32, 128>}, {pipeline_mode = #tpu.pipeline_mode<synchronous>, transform_indices = @transform_1, window_bounds = array<i64: 64, 32>}, {pipeline_mode = #tpu.pipeline_mode<synchronous>, transform_indices = @transform_2, window_bounds = array<i64: 32, 32>}, {pipeline_mode = #tpu.pipeline_mode<synchronous>, transform_indices = @transform_3, window_bounds = array<i64: 128, 2>}, {pipeline_mode = #tpu.pipeline_mode<synchronous>, transform_indices = @transform_4, window_bounds = array<i64: 2, 128>}, {pipeline_mode = #tpu.pipeline_mode<synchronous>, transform_indices = @transform_5, window_bounds = array<i64: 64, 1>}, {pipeline_mode = #tpu.pipeline_mode<synchronous>, transform_indices = @transform_6, window_bounds = array<i64: 32, 1>}, {pipeline_mode = #tpu.pipeline_mode<synchronous>, transform_indices = @transform_7, window_bounds = array<i64: 32, 1>}, {pipeline_mode = #tpu.pipeline_mode<synchronous>, transform_indices = @transform_8, window_bounds = array<i64: 32, 1>}, {transform_indices = @transform_9, window_bounds = array<i64: 1, 1, 32, 128>}, {transform_indices = @transform_10, window_bounds = array<i64: 1, 1, 32, 128>}]} {
    %c0_i32 = arith.constant 0 : i32
    %0 = arith.cmpi eq, %arg1, %c0_i32 : i32
    %1 = arith.extui %0 : i1 to i32
    %c0_i32_0 = arith.constant 0 : i32
    %2 = arith.cmpi ne, %1, %c0_i32_0 : i32
    scf.if %2 {
      %cst_59 = arith.constant 0.000000e+00 : f32
      %84 = vector.broadcast %cst_59 : f32 to vector<32x128xf32>
      %c0_60 = arith.constant 0 : index
      %c0_61 = arith.constant 0 : index
      %85 = vector.load %arg13[%c0_60, %c0_61] : memref<32x128xf32, #tpu.memory_space<vmem>>, vector<32x128xf32>
      tpu.vector_store %arg13[%c0_60, %c0_61], %84 {strides = array<i32>} : memref<32x128xf32, #tpu.memory_space<vmem>>, vector<32x128xf32>,
      %cst_62 = arith.constant 0.000000e+00 : f32
      %86 = vector.broadcast %cst_62 : f32 to vector<64x128xf32>
      %c0_63 = arith.constant 0 : index
      %c0_64 = arith.constant 0 : index
      %87 = vector.load %arg14[%c0_63, %c0_64] : memref<64x128xf32, #tpu.memory_space<vmem>>, vector<64x128xf32>
      tpu.vector_store %arg14[%c0_63, %c0_64], %86 {strides = array<i32>} : memref<64x128xf32, #tpu.memory_space<vmem>>, vector<64x128xf32>,
      %cst_65 = arith.constant 0.000000e+00 : f32
      %88 = vector.broadcast %cst_65 : f32 to vector<32x128xf32>
      %c0_66 = arith.constant 0 : index
      %c0_67 = arith.constant 0 : index
      %89 = vector.load %arg15[%c0_66, %c0_67] : memref<32x128xf32, #tpu.memory_space<vmem>>, vector<32x128xf32>
      tpu.vector_store %arg15[%c0_66, %c0_67], %88 {strides = array<i32>} : memref<32x128xf32, #tpu.memory_space<vmem>>, vector<32x128xf32>,
      %cst_68 = arith.constant 0.000000e+00 : f32
      %90 = vector.broadcast %cst_68 : f32 to vector<32x2xf32>
      %c0_69 = arith.constant 0 : index
      %c0_70 = arith.constant 0 : index
      %91 = vector.load %arg16[%c0_69, %c0_70] : memref<32x2xf32, #tpu.memory_space<vmem>>, vector<32x2xf32>
      tpu.vector_store %arg16[%c0_69, %c0_70], %90 {strides = array<i32>} : memref<32x2xf32, #tpu.memory_space<vmem>>, vector<32x2xf32>,
    } else {
    }
    %c0 = arith.constant 0 : index
    %c0_1 = arith.constant 0 : index
    %c0_2 = arith.constant 0 : index
    %c0_3 = arith.constant 0 : index
    %3 = vector.load %arg2[%c0, %c0_1, %c0_2, %c0_3] : memref<1x1x32x128xf32, #tpu.memory_space<vmem>>, vector<1x1x32x128xf32>
    %4 = vector.shape_cast %3 : vector<1x1x32x128xf32> to vector<32x128xf32>
    %c0_4 = arith.constant 0 : index
    %c0_5 = arith.constant 0 : index
    %5 = vector.load %arg13[%c0_4, %c0_5] : memref<32x128xf32, #tpu.memory_space<vmem>>, vector<32x128xf32>
    %6 = arith.addf %5, %4 : vector<32x128xf32>
    %cst = arith.constant 5.000000e-01 : f32
    %7 = vector.broadcast %cst : f32 to vector<32x128xf32>
    %8 = arith.mulf %6, %7 : vector<32x128xf32>
    %cst_6 = arith.constant 1.000000e+00 : f32
    %9 = vector.broadcast %cst_6 : f32 to vector<32x128xf32>
    %10 = arith.cmpf oge, %8, %9 : vector<32x128xf32>
    %cst_7 = arith.constant 0.000000e+00 : f32
    %11 = vector.broadcast %cst_7 : f32 to vector<32x128xf32>
    %12 = arith.select %10, %11, %8 : vector<32x128xi1>, vector<32x128xf32>
    %c0_8 = arith.constant 0 : index
    %c0_9 = arith.constant 0 : index
    %13 = vector.load %arg13[%c0_8, %c0_9] : memref<32x128xf32, #tpu.memory_space<vmem>>, vector<32x128xf32>
    tpu.vector_store %arg13[%c0_8, %c0_9], %12 {strides = array<i32>} : memref<32x128xf32, #tpu.memory_space<vmem>>, vector<32x128xf32>,
    %14 = arith.extui %10 : vector<32x128xi1> to vector<32x128xi32>
    %15 = arith.sitofp %14 : vector<32x128xi32> to vector<32x128xf32>
    %c0_10 = arith.constant 0 : index
    %c0_11 = arith.constant 0 : index
    %16 = vector.load %arg3[%c0_10, %c0_11] : memref<64x32xbf16, #tpu.memory_space<vmem>>, vector<64x32xbf16>
    %17 = arith.truncf %15 : vector<32x128xf32> to vector<32x128xbf16>
    %cst_12 = arith.constant dense<0.000000e+00> : vector<64x128xf32>
    %18 = tpu.matmul %16, %17, %cst_12 {dimension_numbers = #tpu.dot_dimension_numbers<[1], [0], [0], [1], [0, 0, 1, 1], [], []>} : vector<64x32xbf16>, vector<32x128xbf16>, vector<64x128xf32> -> vector<64x128xf32>
    %c0_13 = arith.constant 0 : index
    %c0_14 = arith.constant 0 : index
    %19 = vector.load %arg7[%c0_13, %c0_14] : memref<64x1xf32, #tpu.memory_space<vmem>>, vector<64x1xf32>
    %20 = vector.broadcast %19 : vector<64x1xf32> to vector<64x128xf32>
    %21 = arith.addf %18, %20 : vector<64x128xf32>
    %c0_15 = arith.constant 0 : index
    %c0_16 = arith.constant 0 : index
    %22 = vector.load %arg14[%c0_15, %c0_16] : memref<64x128xf32, #tpu.memory_space<vmem>>, vector<64x128xf32>
    %23 = arith.addf %22, %21 : vector<64x128xf32>
    %cst_17 = arith.constant 5.000000e-01 : f32
    %24 = vector.broadcast %cst_17 : f32 to vector<64x128xf32>
    %25 = arith.mulf %23, %24 : vector<64x128xf32>
    %cst_18 = arith.constant 1.000000e+00 : f32
    %26 = vector.broadcast %cst_18 : f32 to vector<64x128xf32>
    %27 = arith.cmpf oge, %25, %26 : vector<64x128xf32>
    %cst_19 = arith.constant 0.000000e+00 : f32
    %28 = vector.broadcast %cst_19 : f32 to vector<64x128xf32>
    %29 = arith.select %27, %28, %25 : vector<64x128xi1>, vector<64x128xf32>
    %c0_20 = arith.constant 0 : index
    %c0_21 = arith.constant 0 : index
    %30 = vector.load %arg14[%c0_20, %c0_21] : memref<64x128xf32, #tpu.memory_space<vmem>>, vector<64x128xf32>
    tpu.vector_store %arg14[%c0_20, %c0_21], %29 {strides = array<i32>} : memref<64x128xf32, #tpu.memory_space<vmem>>, vector<64x128xf32>,
    %31 = arith.extui %27 : vector<64x128xi1> to vector<64x128xi32>
    %32 = arith.sitofp %31 : vector<64x128xi32> to vector<64x128xf32>
    %33 = vector.extract_strided_slice %32 {offsets = [0, 0], sizes = [32, 128], strides = [1, 1]} : vector<64x128xf32> to vector<32x128xf32>
    %34 = vector.extract_strided_slice %32 {offsets = [32, 0], sizes = [32, 128], strides = [1, 1]} : vector<64x128xf32> to vector<32x128xf32>
    %c0_22 = arith.constant 0 : index
    %c0_23 = arith.constant 0 : index
    %35 = vector.load %arg8[%c0_22, %c0_23] : memref<32x1xf32, #tpu.memory_space<vmem>>, vector<32x1xf32>
    %36 = vector.broadcast %35 : vector<32x1xf32> to vector<32x128xf32>
    %37 = arith.mulf %15, %36 : vector<32x128xf32>
    %c0_24 = arith.constant 0 : index
    %c0_25 = arith.constant 0 : index
    %38 = vector.load %arg9[%c0_24, %c0_25] : memref<32x1xf32, #tpu.memory_space<vmem>>, vector<32x1xf32>
    %39 = vector.broadcast %38 : vector<32x1xf32> to vector<32x128xf32>
    %40 = arith.addf %37, %39 : vector<32x128xf32>
    %c0_26 = arith.constant 0 : index
    %c0_27 = arith.constant 0 : index
    %41 = vector.load %arg15[%c0_26, %c0_27] : memref<32x128xf32, #tpu.memory_space<vmem>>, vector<32x128xf32>
    %42 = arith.addf %41, %40 : vector<32x128xf32>
    %cst_28 = arith.constant 5.000000e-01 : f32
    %43 = vector.broadcast %cst_28 : f32 to vector<32x128xf32>
    %44 = arith.mulf %42, %43 : vector<32x128xf32>
    %cst_29 = arith.constant 1.000000e+00 : f32
    %45 = vector.broadcast %cst_29 : f32 to vector<32x128xf32>
    %46 = arith.cmpf oge, %44, %45 : vector<32x128xf32>
    %cst_30 = arith.constant 0.000000e+00 : f32
    %47 = vector.broadcast %cst_30 : f32 to vector<32x128xf32>
    %48 = arith.select %46, %47, %44 : vector<32x128xi1>, vector<32x128xf32>
    %c0_31 = arith.constant 0 : index
    %c0_32 = arith.constant 0 : index
    %49 = vector.load %arg15[%c0_31, %c0_32] : memref<32x128xf32, #tpu.memory_space<vmem>>, vector<32x128xf32>
    tpu.vector_store %arg15[%c0_31, %c0_32], %48 {strides = array<i32>} : memref<32x128xf32, #tpu.memory_space<vmem>>, vector<32x128xf32>,
    %50 = arith.extui %46 : vector<32x128xi1> to vector<32x128xi32>
    %51 = arith.sitofp %50 : vector<32x128xi32> to vector<32x128xf32>
    %52 = arith.mulf %34, %51 : vector<32x128xf32>
    %53 = arith.truncf %52 : vector<32x128xf32> to vector<32x128xbf16>
    %c0_33 = arith.constant 0 : index
    %c0_34 = arith.constant 0 : index
    %54 = vector.load %arg5[%c0_33, %c0_34] : memref<128x2xbf16, #tpu.memory_space<vmem>>, vector<128x2xbf16>
    %cst_35 = arith.constant dense<0.000000e+00> : vector<32x2xf32>
    %55 = tpu.matmul %53, %54, %cst_35 {dimension_numbers = #tpu.dot_dimension_numbers<[1], [0], [0], [1], [0, 0, 1, 1], [], []>} : vector<32x128xbf16>, vector<128x2xbf16>, vector<32x2xf32> -> vector<32x2xf32>
    %c0_36 = arith.constant 0 : index
    %c0_37 = arith.constant 0 : index
    %56 = vector.load %arg16[%c0_36, %c0_37] : memref<32x2xf32, #tpu.memory_space<vmem>>, vector<32x2xf32>
    %57 = arith.addf %56, %55 : vector<32x2xf32>
    %cst_38 = arith.constant 5.000000e-01 : f32
    %58 = vector.broadcast %cst_38 : f32 to vector<32x2xf32>
    %59 = arith.mulf %57, %58 : vector<32x2xf32>
    %cst_39 = arith.constant 5.000000e-01 : f32
    %60 = vector.broadcast %cst_39 : f32 to vector<32x2xf32>
    %61 = arith.cmpf oge, %59, %60 : vector<32x2xf32>
    %cst_40 = arith.constant 0.000000e+00 : f32
    %62 = vector.broadcast %cst_40 : f32 to vector<32x2xf32>
    %63 = arith.select %61, %62, %59 : vector<32x2xi1>, vector<32x2xf32>
    %c0_41 = arith.constant 0 : index
    %c0_42 = arith.constant 0 : index
    %64 = vector.load %arg16[%c0_41, %c0_42] : memref<32x2xf32, #tpu.memory_space<vmem>>, vector<32x2xf32>
    tpu.vector_store %arg16[%c0_41, %c0_42], %63 {strides = array<i32>} : memref<32x2xf32, #tpu.memory_space<vmem>>, vector<32x2xf32>,
    %65 = arith.extui %61 : vector<32x2xi1> to vector<32x2xi32>
    %66 = arith.sitofp %65 : vector<32x2xi32> to vector<32x2xf32>
    %67 = arith.truncf %66 : vector<32x2xf32> to vector<32x2xbf16>
    %c0_43 = arith.constant 0 : index
    %c0_44 = arith.constant 0 : index
    %68 = vector.load %arg6[%c0_43, %c0_44] : memref<2x128xbf16, #tpu.memory_space<vmem>>, vector<2x128xbf16>
    %cst_45 = arith.constant dense<0.000000e+00> : vector<32x128xf32>
    %69 = tpu.matmul %67, %68, %cst_45 {dimension_numbers = #tpu.dot_dimension_numbers<[1], [0], [0], [1], [0, 0, 1, 1], [], []>} : vector<32x2xbf16>, vector<2x128xbf16>, vector<32x128xf32> -> vector<32x128xf32>
    %70 = arith.mulf %33, %69 : vector<32x128xf32>
    %71 = arith.truncf %70 : vector<32x128xf32> to vector<32x128xbf16>
    %c0_46 = arith.constant 0 : index
    %c0_47 = arith.constant 0 : index
    %72 = vector.load %arg4[%c0_46, %c0_47] : memref<32x32xbf16, #tpu.memory_space<vmem>>, vector<32x32xbf16>
    %cst_48 = arith.constant dense<0.000000e+00> : vector<32x128xf32>
    %73 = tpu.matmul %72, %71, %cst_48 {dimension_numbers = #tpu.dot_dimension_numbers<[1], [0], [0], [1], [0, 0, 1, 1], [], []>} : vector<32x32xbf16>, vector<32x128xbf16>, vector<32x128xf32> -> vector<32x128xf32>
    %c0_49 = arith.constant 0 : index
    %c0_50 = arith.constant 0 : index
    %74 = vector.load %arg10[%c0_49, %c0_50] : memref<32x1xf32, #tpu.memory_space<vmem>>, vector<32x1xf32>
    %75 = vector.broadcast %74 : vector<32x1xf32> to vector<32x128xf32>
    %76 = arith.addf %73, %75 : vector<32x128xf32>
    %c0_51 = arith.constant 0 : index
    %c0_52 = arith.constant 0 : index
    %c0_53 = arith.constant 0 : index
    %c0_54 = arith.constant 0 : index
    %77 = vector.load %arg11[%c0_51, %c0_52, %c0_53, %c0_54] : memref<1x1x32x128xf32, #tpu.memory_space<vmem>>, vector<1x1x32x128xf32>
    %78 = vector.shape_cast %77 : vector<1x1x32x128xf32> to vector<32x128xf32>
    %79 = vector.shape_cast %76 : vector<32x128xf32> to vector<1x1x32x128xf32>
    tpu.vector_store %arg11[%c0_51, %c0_52, %c0_53, %c0_54], %79 {strides = array<i32>} : memref<1x1x32x128xf32, #tpu.memory_space<vmem>>, vector<1x1x32x128xf32>,
    %80 = arith.truncf %51 : vector<32x128xf32> to vector<32x128xbf16>
    %c0_55 = arith.constant 0 : index
    %c0_56 = arith.constant 0 : index
    %c0_57 = arith.constant 0 : index
    %c0_58 = arith.constant 0 : index
    %81 = vector.load %arg12[%c0_55, %c0_56, %c0_57, %c0_58] : memref<1x1x32x128xbf16, #tpu.memory_space<vmem>>, vector<1x1x32x128xbf16>
    %82 = vector.shape_cast %81 : vector<1x1x32x128xbf16> to vector<32x128xbf16>
    %83 = vector.shape_cast %80 : vector<32x128xbf16> to vector<1x1x32x128xbf16>
    tpu.vector_store %arg12[%c0_55, %c0_56, %c0_57, %c0_58], %83 {strides = array<i32>} : memref<1x1x32x128xbf16, #tpu.memory_space<vmem>>, vector<1x1x32x128xbf16>,
    return
  }
  func.func @transform_0(%arg0: i32, %arg1: i32) -> (i32, i32, i32, i32) {
    %c0_i32 = arith.constant 0 : i32
    %c0_i32_0 = arith.constant 0 : i32
    %c0_i32_1 = arith.constant 0 : i32
    return %arg1, %arg0, %c0_i32, %c0_i32_0 : i32, i32, i32, i32
  }
  func.func @transform_1(%arg0: i32, %arg1: i32) -> (i32, i32) {
    %c0_i32 = arith.constant 0 : i32
    %c0_i32_0 = arith.constant 0 : i32
    %c0_i32_1 = arith.constant 0 : i32
    return %c0_i32, %c0_i32_0 : i32, i32
  }
  func.func @transform_2(%arg0: i32, %arg1: i32) -> (i32, i32) {
    %c0_i32 = arith.constant 0 : i32
    %c0_i32_0 = arith.constant 0 : i32
    %c0_i32_1 = arith.constant 0 : i32
    return %c0_i32, %c0_i32_0 : i32, i32
  }
  func.func @transform_3(%arg0: i32, %arg1: i32) -> (i32, i32) {
    %c0_i32 = arith.constant 0 : i32
    %c0_i32_0 = arith.constant 0 : i32
    %c0_i32_1 = arith.constant 0 : i32
    return %c0_i32, %c0_i32_0 : i32, i32
  }
  func.func @transform_4(%arg0: i32, %arg1: i32) -> (i32, i32) {
    %c0_i32 = arith.constant 0 : i32
    %c0_i32_0 = arith.constant 0 : i32
    %c0_i32_1 = arith.constant 0 : i32
    return %c0_i32, %c0_i32_0 : i32, i32
  }
  func.func @transform_5(%arg0: i32, %arg1: i32) -> (i32, i32) {
    %c0_i32 = arith.constant 0 : i32
    %c0_i32_0 = arith.constant 0 : i32
    %c0_i32_1 = arith.constant 0 : i32
    return %c0_i32, %c0_i32_0 : i32, i32
  }
  func.func @transform_6(%arg0: i32, %arg1: i32) -> (i32, i32) {
    %c0_i32 = arith.constant 0 : i32
    %c0_i32_0 = arith.constant 0 : i32
    %c0_i32_1 = arith.constant 0 : i32
    return %c0_i32, %c0_i32_0 : i32, i32
  }
  func.func @transform_7(%arg0: i32, %arg1: i32) -> (i32, i32) {
    %c0_i32 = arith.constant 0 : i32
    %c0_i32_0 = arith.constant 0 : i32
    %c0_i32_1 = arith.constant 0 : i32
    return %c0_i32, %c0_i32_0 : i32, i32
  }
  func.func @transform_8(%arg0: i32, %arg1: i32) -> (i32, i32) {
    %c0_i32 = arith.constant 0 : i32
    %c0_i32_0 = arith.constant 0 : i32
    %c0_i32_1 = arith.constant 0 : i32
    return %c0_i32, %c0_i32_0 : i32, i32
  }
  func.func @transform_9(%arg0: i32, %arg1: i32) -> (i32, i32, i32, i32) {
    %c0_i32 = arith.constant 0 : i32
    %c0_i32_0 = arith.constant 0 : i32
    %c0_i32_1 = arith.constant 0 : i32
    return %arg1, %arg0, %c0_i32, %c0_i32_0 : i32, i32, i32, i32
  }
  func.func @transform_10(%arg0: i32, %arg1: i32) -> (i32, i32, i32, i32) {
    %c0_i32 = arith.constant 0 : i32
    %c0_i32_0 = arith.constant 0 : i32
    %c0_i32_1 = arith.constant 0 : i32
    return %arg1, %arg0, %c0_i32, %c0_i32_0 : i32, i32, i32, i32
  }
}

</mosaic_0001>

<bundles_post_ra>
// kernel: ms_ssa_conv_forward.1
= control target key start
LH: loop header
LB: loop body
LE: loop exit
PB: predicated region body
PF: predicated region fallthrough
CT: control target
= control target key end

     0   :  { %s1546_s13 = smov 0   ;;  %s1548_s14 = smov 0   ;;  %s1836_s0 = inlined_call_operand.vmem [shape: f32[4,1,32,128], index: 0, kind: input, shape index: {}]   ;;  %s1837_s1 = inlined_call_operand.vmem [shape: bf16[64,32], index: 1, kind: input, shape index: {}]   ;;  %s1838_s2 = inlined_call_operand.vmem [shape: bf16[32,32], index: 2, kind: input, shape index: {}]   ;;  %s1839_s3 = inlined_call_operand.vmem [shape: bf16[128,2], index: 3, kind: input, shape index: {}]   ;;  %s1840_s4 = inlined_call_operand.vmem [shape: bf16[2,128], index: 4, kind: input, shape index: {}]   ;;  %s1841_s5 = inlined_call_operand.vmem [shape: f32[64,1], index: 5, kind: input, shape index: {}]   ;;  %s1842_s6 = inlined_call_operand.vmem [shape: f32[32,1], index: 6, kind: input, shape index: {}]   ;;  %s1843_s7 = inlined_call_operand.vmem [shape: f32[32,1], index: 7, kind: input, shape index: {}]   ;;  %s1844_s8 = inlined_call_operand.vmem [shape: f32[32,1], index: 8, kind: input, shape index: {}]   ;;  %s1845_s9 = inlined_call_operand.vmem [shape: f32[4,1,32,128], index: 9, kind: output, shape index: {0}]   ;;  %s1846_s10 = inlined_call_operand.vmem [shape: bf16[4,1,32,128], index: 10, kind: output, shape index: {1}]  }
   0x1   :  { %s1550_s15 = smov 0  }
   0x2 LB: > { %s30_s16 = sadd.s32 1, %s1481_s14  ;;  %p1275_p0 = scmp.ge.s32.totalorder %s1485_s15, 1  ;;  %s1485_s15 = sphi %s1550_s15, %s21_s15   ;;  %s1481_s14 = sphi %s1548_s14, %s1848_s14   ;;  %s1477_s13 = sphi %s1546_s13, %s1847_s13  }
   0x3   : > { %p31_p1 = scmp.ge.s32.totalorder %s30_s16, 4  ;;  %p337_p2 = scmp.lt.s32.totalorder %s1485_s15, 5 }
   0x5   : > { %s1850_s16 = smov (%p31_p1, %s30_s16), 0  ;;  %p338_p3 = pnand %p1275_p0, %p337_p2 }
   0x6   : > { %p392_p4 = scmp.lt.s32.totalorder (!%p338_p3), %s1477_s13, 3  ;;  %p1282_p5 = scmp.ne.s32.totalorder (!%p338_p3), %s1477_s13, 0 }
   0x7   : > { %341 = sbr.rel (%p338_p3) target bundleno = 947 (0x3b3), region = 56 }
   0xe   : > { %s393_s17 = scalar_select %p392_p4, %s1477_s13, 3 }
   0xf   : > { %423 = sbr.rel (%p1282_p5) target bundleno = 26 (0x1a), region = 60  ;;  %vm440_vm0 = vcmask (!%p1282_p5), 15360   ;;  %v1487_v0 = vmov (!%p1282_p5), 0.0  }
  0x10   : > { %s1335_s18 = sshll.u32 %s393_s17, 5  ;;  %s1337_s19 = sshll.u32 %s393_s17, 4  ;;  %424 = vst [vmem:[#allocation2] sm:$0xff] (!%p1282_p5), %v1487_v0  ;;  %425 = vst [vmem:[#allocation2 + $0x8] sm:$0xff] (!%p1282_p5), %v1487_v0 }
  0x11   : > { %s1567_s22 = scalar_lea.vmem %s1836_s0, %s1335_s18  ;;  %s1572_s25 = scalar_lea.vmem %s1845_s9, %s1335_s18  ;;  %426 = vst [vmem:[#allocation2 + $0x10] sm:$0xff] (!%p1282_p5), %v1487_v0  ;;  %427 = vst [vmem:[#allocation2 + $0x18] sm:$0xff] (!%p1282_p5), %v1487_v0 }
  0x12   : > { %s1577_s28 = scalar_lea.vmem %s1846_s10, %s1337_s19  ;;  %428 = vst [vmem:[#allocation3] sm:$0xff] (!%p1282_p5), %v1487_v0  ;;  %429 = vst [vmem:[#allocation3 + $0x8] sm:$0xff] (!%p1282_p5), %v1487_v0 }
  0x13   : > { %430 = vst [vmem:[#allocation3 + $0x10] sm:$0xff] (!%p1282_p5), %v1487_v0  ;;  %431 = vst [vmem:[#allocation3 + $0x18] sm:$0xff] (!%p1282_p5), %v1487_v0 }
  0x14   : > { %432 = vst [vmem:[#allocation3 + $0x20] sm:$0xff] (!%p1282_p5), %v1487_v0  ;;  %433 = vst [vmem:[#allocation3 + $0x28] sm:$0xff] (!%p1282_p5), %v1487_v0 }
  0x15   : > { %434 = vst [vmem:[#allocation3 + $0x30] sm:$0xff] (!%p1282_p5), %v1487_v0  ;;  %435 = vst [vmem:[#allocation3 + $0x38] sm:$0xff] (!%p1282_p5), %v1487_v0 }
  0x16   : > { %436 = vst [vmem:[#allocation4] sm:$0xff] %v1487_v0  ;;  %437 = vst [vmem:[#allocation4 + $0x8] sm:$0xff] %v1487_v0 }
  0x17   : > { %438 = vst [vmem:[#allocation4 + $0x10] sm:$0xff] %v1487_v0  ;;  %439 = vst [vmem:[#allocation4 + $0x18] sm:$0xff] %v1487_v0 }
  0x18   : > { %441 = vst.msk [vmem:[#allocation5] sm:$0xff] %vm440_vm0, %v1487_v0  ;;  %442 = vst.msk [vmem:[#allocation5 + $0x8] sm:$0xff] %vm440_vm0, %v1487_v0 }
  0x19   : > { %443 = vst.msk [vmem:[#allocation5 + $0x10] sm:$0xff] %vm440_vm0, %v1487_v0  ;;  %444 = vst.msk [vmem:[#allocation5 + $0x18] sm:$0xff] %vm440_vm0, %v1487_v0 }
  0x1a PF: > { %v445_v1 = vld [vmem:[%s1567_s22] sm:$0xff]  ;;  %v446_v2 = vld [vmem:[%s1567_s22 + $0x8] sm:$0xff]  ;;  %v447_v6 = vld [vmem:[%s1567_s22 + $0x10] sm:$0xff]  ;;  %vm559_vm1 = vcmask 261120   ;;  %v1488_v11 = vmov 0   ;;  %vm950_vm8 = vcmask 1040384  }
  0x1b   : > { %v449_v3 = vld [vmem:[#allocation2] sm:$0xff]  ;;  %v450_v4 = vld [vmem:[#allocation2 + $0x8] sm:$0xff]  ;;  %v448_v7 = vld [vmem:[%s1567_s22 + $0x18] sm:$0xff]  ;;  %1448 = vset.pattern.permute.xlu1 %v1488_v11  ;;  %1447 = vset.pattern.permute.xlu0 %v1488_v11  ;;  %v1489_v22 = vmov 1.0|1.0   ;;  %v1490_v61 = vmov 0.0  }
  0x1c   : > { %v453_v5 = vadd.f32 %v449_v3, %v445_v1  ;;  %v454_v8 = vadd.f32 %v450_v4, %v446_v2  ;;  %v451_v9 = vld [vmem:[#allocation2 + $0x10] sm:$0xff]  ;;  %v452_v10 = vld [vmem:[#allocation2 + $0x18] sm:$0xff]  ;;  %v1449_v15 = vld [vmem:[%s1837_s1] sm:$0xff]  }
  0x1d   : > { %v455_v13 = vadd.f32 %v451_v9, %v447_v6  ;;  %v456_v14 = vadd.f32 %v452_v10, %v448_v7  ;;  %1376 = vmatprep.mubr.msk.bf16.mxu0 %vm559_vm1, %v1449_v15  ;;  %v703_v21 = vld [vmem:[%s1842_s6 + $0x10] sm:$0xff]  ;;  %v701_v25 = vld [vmem:[%s1842_s6] sm:$0xff]  ;;  %v704_v26 = vld [vmem:[%s1842_s6 + $0x18] sm:$0xff] }
  0x1e   : > { %v1587_v12 = vmul.f32 0.5, %v453_v5  ;;  %v1592_v16 = vmul.f32 0.5, %v454_v8  ;;  %717 = vperm.xlu1 %1448, %v703_v21   ;;  %707 = vperm.xlu0 %1447, %v701_v25   ;;  %v702_v27 = vld [vmem:[%s1842_s6 + $0x8] sm:$0xff]  ;;  %v1451_v29 = vld [vmem:[%s1837_s1 + $0x10] sm:$0xff]   ;;  %v495_v31 = vld [vmem:[%s1841_s5 + $0x20] sm:$0xff] }
  0x1f   : > { %v1595_v17 = vmul.f32 0.5, %v455_v13  ;;  %v1597_v18 = vmul.f32 0.5, %v456_v14  ;;  %v1450_v28 = vld [vmem:[%s1837_s1 + $0x8] sm:$0xff]   ;;  %v729_v33 = vld [vmem:[%s1843_s7] sm:$0xff]  ;;  %v1452_v34 = vld [vmem:[%s1837_s1 + $0x18] sm:$0xff]  }
  0x20   : > { %vm461_vm2 = vcmp.ge.f32.partialorder %v1587_v12, 1.0  ;;  %vm462_vm3 = vcmp.ge.f32.partialorder %v1592_v16, 1.0  ;;  %v496_v30 = vld [vmem:[%s1841_s5 + $0x28] sm:$0xff]  ;;  %v498_v35 = vld [vmem:[%s1841_s5 + $0x38] sm:$0xff]  ;;  %v497_v36 = vld [vmem:[%s1841_s5 + $0x30] sm:$0xff] }
  0x21   : > { %v465_v19 = vsel %vm461_vm2, 0.0, %v1587_v12  ;;  %v466_v20 = vsel %vm462_vm3, 0.0, %v1592_v16  ;;  %vm1291_vm4 = vmpackc.low %vm462_vm3, %vm461_vm2  ;;  %vm463_vm5 = vcmp.ge.f32.partialorder %v1595_v17, 1.0  ;;  %vm464_vm6 = vcmp.ge.f32.partialorder %v1597_v18, 1.0  ;;  %v730_v32 = vld [vmem:[%s1843_s7 + $0x8] sm:$0xff]  ;;  %v732_v37 = vld [vmem:[%s1843_s7 + $0x18] sm:$0xff] }
  0x22   : > { %469 = vst [vmem:[#allocation2] sm:$0xff] %v465_v19  ;;  %470 = vst [vmem:[#allocation2 + $0x8] sm:$0xff] %v466_v20  ;;  %1372 = vmatprep.subr.msk.bf16.mxu0 %vm1291_vm4, %v1489_v22  ;;  %v467_v23 = vsel %vm463_vm5, 0.0, %v1595_v17  ;;  %v468_v24 = vsel %vm464_vm6, 0.0, %v1597_v18  ;;  %722 = vperm.xlu1 %1448, %v704_v26   ;;  %v731_v38 = vld [vmem:[%s1843_s7 + $0x10] sm:$0xff]  ;;  %v492_v39 = vld [vmem:[%s1841_s5 + $0x8] sm:$0xff] }
  0x23   : > { %vm1293_vm7 = vmpackc.low %vm464_vm6, %vm463_vm5  ;;  %1373 = vmatpush3.bf16.msk.msra.mxu0 %vm1291_vm4, %v1489_v22  ;;  %471 = vst [vmem:[#allocation2 + $0x10] sm:$0xff] %v467_v23  ;;  %712 = vperm.xlu0 %1447, %v702_v27   ;;  %v491_v40 = vld [vmem:[%s1841_s5] sm:$0xff]  ;;  %v494_v41 = vld [vmem:[%s1841_s5 + $0x18] sm:$0xff]  ;;  %v1284_v62 = vsel %vm462_vm3, 1.0, %v1490_v61  ;;  %v1283_v63 = vsel %vm461_vm2, 1.0, %v1490_v61  ;;  %v1286_v9 = vsel %vm464_vm6, 1.0, %v1490_v61 }
  0x24   : > { %472 = vst [vmem:[#allocation2 + $0x18] sm:$0xff] %v468_v24  ;;  %1374 = vmatprep.subr.msk.bf16.mxu0 %vm1293_vm7, %v1489_v22  ;;  %v493_v42 = vld [vmem:[%s1841_s5 + $0x10] sm:$0xff]  ;;  %v1014_v43 = vld [vmem:[%s1844_s8 + $0x8] sm:$0xff]  ;;  %v1013_v44 = vld [vmem:[%s1844_s8] sm:$0xff]  ;;  %v1285_v11 = vsel %vm463_vm5, 1.0, %v1490_v61  ;;  %vm928_vm6 = vcmask 15360  }
  0x25   : > { %v1016_v45 = vld [vmem:[%s1844_s8 + $0x18] sm:$0xff]  ;;  %v1015_v46 = vld [vmem:[%s1844_s8 + $0x10] sm:$0xff]  ;;  %v1453_v47 = vld [vmem:[%s1839_s3] sm:$0xff]  }
  0x26   : > { %526 = vperm.xlu1 %1448, %v496_v30   ;;  %v1454_v48 = vld [vmem:[%s1839_s3 + $0x8] sm:$0xff]   ;;  %1384 = vmatprep.subr.bf16.mxu1 %v1453_v47  ;;  %v1455_v49 = vld [vmem:[%s1839_s3 + $0x10] sm:$0xff]   ;;  %v1456_v50 = vld [vmem:[%s1839_s3 + $0x18] sm:$0xff]  }
  0x27   : > { %1375 = vmatpush3.bf16.msk.msra.mxu0 %vm1293_vm7, %v1489_v22  ;;  %521 = vperm.xlu0 %1447, %v495_v31   ;;  %v1457_v51 = vld [vmem:[%s1839_s3 + $0x20] sm:$0xff]   ;;  %v1458_v52 = vld [vmem:[%s1839_s3 + $0x28] sm:$0xff]   ;;  %v1459_v53 = vld [vmem:[%s1839_s3 + $0x30] sm:$0xff]  }
  0x28   : > { %1385 = vmatpush3.bf16.msra.mxu1 %v1453_v47  ;;  %v1460_v54 = vld [vmem:[%s1839_s3 + $0x38] sm:$0xff]   ;;  %v943_v55 = vld [vmem:[%s1840_s4] sm:$0x1]  ;;  %v758_v4 = vld [vmem:[#allocation4 + $0x8] sm:$0xff] }
  0x29   : > { %1386 = vmatprep.subr.bf16.mxu1 %v1454_v48  ;;  %1418 = vmatprep.subr.msk.bf16.mxu0 %vm950_vm8, %v943_v55  ;;  %v952_v56 = vsel %vm950_vm8, %v943_v55, 0  ;;  %v757_v7 = vld [vmem:[#allocation4] sm:$0xff]  ;;  %v760_v22 = vld [vmem:[#allocation4 + $0x18] sm:$0xff]  ;;  %v759_v25 = vld [vmem:[#allocation4 + $0x10] sm:$0xff] }
  0x2a   : > { %1377 = vmatmul.mubr.msk.bf16.vlgmr.msra.gmra.mrb[0].mxu0 %vm559_vm1, %v1450_v28  ;;  %740 = vperm.xlu1 %1448, %v730_v32   ;;  %v637_v47 = vld [vmem:[#allocation3] sm:$0xff]  ;;  %v638_v55 = vld [vmem:[#allocation3 + $0x8] sm:$0xff] }
  0x2b   : > { %1380 = vmatprep.mubr.msk.bf16.mxu0 %vm559_vm1, %v1451_v29  ;;  %735 = vperm.xlu0 %1447, %v729_v33  }
  0x2c   : > { %1387 = vmatpush3.bf16.msra.mxu1 %v1454_v48  ;;  %1405 = vmatpush3.bf16.msra.mxu0 %v952_v56 }
  0x2d   : > { %1388 = vmatprep.subr.bf16.mxu1 %v1455_v49 }
  0x2e   : > { %536 = vperm.xlu1 %1448, %v498_v35  }
  0x2f   : > { %531 = vperm.xlu0 %1447, %v497_v36  }
  0x30   : > { %1389 = vmatpush3.bf16.msra.mxu1 %v1455_v49 }
  0x31   : > { %1390 = vmatprep.subr.bf16.mxu1 %v1456_v50 }
  0x32   : > { %1381 = vmatmul.mubr.msk.bf16.gmra.mrb[4].mxu0 %vm559_vm1, %v1452_v34  ;;  %750 = vperm.xlu1 %1448, %v732_v37  }
  0x33   : > { %745 = vperm.xlu0 %1447, %v731_v38  }
  0x34   : > { %1391 = vmatpush3.bf16.msra.mxu1 %v1456_v50 }
  0x35   : > { %1392 = vmatprep.subr.bf16.mxu1 %v1457_v51 }
  0x36   : > { %506 = vperm.xlu1 %1448, %v492_v39  }
  0x37   : > { %501 = vperm.xlu0 %1447, %v491_v40  }
  0x38   : > { %1393 = vmatpush3.bf16.msra.mxu1 %v1457_v51  ;;  %v640_v51 = vld [vmem:[#allocation3 + $0x18] sm:$0xff] }
  0x39   : > { %1394 = vmatprep.subr.bf16.mxu1 %v1458_v52 }
  0x3a   : > { %516 = vperm.xlu1 %1448, %v494_v41  }
  0x3b   : > { %511 = vperm.xlu0 %1447, %v493_v42  }
  0x3c   : > { %1395 = vmatpush3.bf16.msra.mxu1 %v1458_v52 }
  0x3d   : > { %1396 = vmatprep.subr.bf16.mxu1 %v1459_v53 }
  0x3e   : > { %1024 = vperm.xlu1 %1448, %v1014_v43  }
  0x3f   : > { %1019 = vperm.xlu0 %1447, %v1013_v44   ;;  %v639_v44 = vld [vmem:[#allocation3 + $0x10] sm:$0xff] }
  0x40   : > { %1397 = vmatpush3.bf16.msra.mxu1 %v1459_v53 }
  0x41   : > { %1398 = vmatprep.subr.bf16.mxu1 %v1460_v54 }
  0x42   : > { %1034 = vperm.xlu1 %1448, %v1016_v45  }
  0x43   : > { %1029 = vperm.xlu0 %1447, %v1015_v46  }
  0x44   : > { %1399 = vmatpush3.bf16.msra.mxu1 %v1460_v54 }
  0x9d   : > { %v718_v57 = vpop.permute.xlu1 %717  ;;  %v708_v58 = vpop.permute.xlu0 %707 }
  0x9e   : > { %v725_v3 = vmul.f32 %v1283_v63, %v708_v58  ;;  %v727_v20 = vmul.f32 %v1285_v11, %v718_v57 }
  0xa1   : > { %v723_v59 = vpop.permute.xlu1 %722 }
  0xa2   : > { %v713_v60 = vpop.permute.xlu0 %712  ;;  %v728_v15 = vmul.f32 %v1286_v9, %v723_v59 }
  0xa3   : > { %v726_v1 = vmul.f32 %v1284_v62, %v713_v60 }
  0xa5   : > { %v1728_v0 = vpop.permute.xlu1 %526 }
  0xa6   : > { %v1730_v2 = vpop.permute.xlu0 %521 }
  0xa9   : > { %v741_v5 = vpop.permute.xlu1 %740 }
  0xaa   : > { %v754_v6 = vadd.f32 %v741_v5, %v726_v1  ;;  %v736_v8 = vpop.permute.xlu0 %735 }
  0xab   : > { %v753_v10 = vadd.f32 %v736_v8, %v725_v3  ;;  %v641_v8 = vld [vmem:[#allocation3 + $0x20] sm:$0xff] }
  0xac   : > { %v762_v12 = vadd.f32 %v758_v4, %v754_v6  ;;  %v643_v4 = vld [vmem:[#allocation3 + $0x30] sm:$0xff] }
  0xad   : > { %v761_v13 = vadd.f32 %v757_v7, %v753_v10  ;;  %v1738_v14 = vpop.permute.xlu1 %536 }
  0xae   : > { %v766_v16 = vmul.f32 0.5, %v762_v12  ;;  %v532_v19 = vpop.permute.xlu0 %531  ;;  %v644_v12 = vld [vmem:[#allocation3 + $0x38] sm:$0xff] }
  0xaf   : > { %v765_v21 = vmul.f32 0.5, %v761_v13 }
  0xb0   : > { %vm770_vm9 = vcmp.ge.f32.partialorder %v766_v16, 1.0 }
  0xb1   : > { %v751_v23 = vpop.permute.xlu1 %750  ;;  %vm769_vm10 = vcmp.ge.f32.partialorder %v765_v21, 1.0  ;;  %v774_v18 = vsel %vm770_vm9, 0.0, %v766_v16  ;;  %v1741_v24 = vsel %vm770_vm9, 1.0, %v1490_v61 }
  0xb2   : > { %v756_v17 = vadd.f32 %v751_v23, %v728_v15  ;;  %v746_v26 = vpop.permute.xlu0 %745  ;;  %v773_v27 = vsel %vm769_vm10, 0.0, %v765_v21  ;;  %778 = vst [vmem:[#allocation4 + $0x8] sm:$0xff] %v774_v18  ;;  %v1744_v28 = vsel %vm769_vm10, 1.0, %v1490_v61 }
  0xb3   : > { %v755_v29 = vadd.f32 %v746_v26, %v727_v20  ;;  %777 = vst [vmem:[#allocation4] sm:$0xff] %v773_v27  ;;  %v1343_v30 = vpack.c.bf16 %v1741_v24, %v1744_v28  ;;  %v642_v20 = vld [vmem:[#allocation3 + $0x28] sm:$0xff] }
  0xb4   : > { %v764_v31 = vadd.f32 %v760_v22, %v756_v17 }
  0xb5   : > { %v763_v32 = vadd.f32 %v759_v25, %v755_v29  ;;  %1344 = vst [vmem:[%s1577_s28] sm:$0xff] %v1343_v30   ;;  %v507_v41 = vpop.permute.xlu1 %506 }
  0xb6   : > { %v768_v33 = vmul.f32 0.5, %v764_v31  ;;  %v502_v40 = vpop.permute.xlu0 %501 }
  0xb7   : > { %v767_v34 = vmul.f32 0.5, %v763_v32 }
  0xb8   : > { %vm772_vm11 = vcmp.ge.f32.partialorder %v768_v33, 1.0 }
  0xb9   : > { %v776_v35 = vsel %vm772_vm11, 0.0, %v768_v33  ;;  %v1750_v36 = vsel %vm772_vm11, 1.0, %v1490_v61  ;;  %vm771_vm12 = vcmp.ge.f32.partialorder %v767_v34, 1.0  ;;  %v517_v48 = vpop.permute.xlu1 %516 }
  0xba   : > { %780 = vst [vmem:[#allocation4 + $0x18] sm:$0xff] %v776_v35  ;;  %v775_v37 = vsel %vm771_vm12, 0.0, %v767_v34  ;;  %v1753_v38 = vsel %vm771_vm12, 1.0, %v1490_v61  ;;  %v512_v42 = vpop.permute.xlu0 %511 }
  0xbb   : > { %779 = vst [vmem:[#allocation4 + $0x10] sm:$0xff] %v775_v37  ;;  %v1346_v39 = vpack.c.bf16 %v1750_v36, %v1753_v38 }
  0xbd   : > { %1348 = vst [vmem:[%s1577_s28 + $0x8] sm:$0xff] %v1346_v39  }
  0xfd   : > { %v1378_v43 = vpop.f32.mrb[0].mxu0 }
  0xfe   : > { %v615_v45 = vadd.f32 %v1378_v43, %v512_v42  ;;  %v606_v46 = vpop.f32.mrb[1].mxu0  ;;  %v910_v43 = vld [vmem:[#allocation5 + $0x10] sm:$0xff] }
  0xff   : > { %v607_v49 = vadd.f32 %v606_v46, %v502_v40  ;;  %v1379_v50 = vpop.f32.mrb[2].mxu0  ;;  %v911_v46 = vld [vmem:[#allocation5 + $0x18] sm:$0xff] }
 0x100   : > { %v647_v52 = vadd.f32 %v639_v44, %v615_v45  ;;  %v618_v53 = vadd.f32 %v1379_v50, %v517_v48  ;;  %v609_v54 = vpop.f32.mrb[3].mxu0  ;;  %v908_v44 = vld [vmem:[#allocation5] sm:$0xff] }
 0x101   : > { %v645_v56 = vadd.f32 %v637_v47, %v607_v49  ;;  %v610_v57 = vadd.f32 %v609_v54, %v507_v41  ;;  %v909_v49 = vld [vmem:[#allocation5 + $0x8] sm:$0xff] }
 0x102   : > { %v1758_v58 = vmul.f32 0.5, %v647_v52  ;;  %v648_v59 = vadd.f32 %v640_v51, %v618_v53 }
 0x103   : > { %v1760_v60 = vmul.f32 0.5, %v645_v56  ;;  %v646_v62 = vadd.f32 %v638_v55, %v610_v57 }
 0x104   : > { %v1762_v63 = vmul.f32 0.5, %v648_v59  ;;  %vm663_vm13 = vcmp.ge.f32.partialorder %v1758_v58, 1.0 }
 0x105   : > { %v1765_v1 = vmul.f32 0.5, %v646_v62  ;;  %v1382_v3 = vpop.f32.mrb[4].mxu0  ;;  %v671_v5 = vsel %vm663_vm13, 0.0, %v1758_v58  ;;  %vm661_vm14 = vcmp.ge.f32.partialorder %v1760_v60, 1.0 }
 0x106   : > { %v631_v6 = vadd.f32 %v1382_v3, %v532_v19  ;;  %v622_v7 = vpop.f32.mrb[5].mxu0  ;;  %679 = vst [vmem:[#allocation3 + $0x10] sm:$0xff] %v671_v5  ;;  %v669_v9 = vsel %vm661_vm14, 0.0, %v1760_v60  ;;  %vm664_vm15 = vcmp.ge.f32.partialorder %v1762_v63, 1.0  ;;  %v1462_v60 = vld [vmem:[%s1838_s2 + $0x8] sm:$0xff]  }
 0x107   : > { %v623_v10 = vadd.f32 %v622_v7, %v1730_v2  ;;  %v1383_v11 = vpop.f32.mrb[6].mxu0  ;;  %677 = vst [vmem:[#allocation3] sm:$0xff] %v669_v9  ;;  %v672_v13 = vsel %vm664_vm15, 0.0, %v1762_v63  ;;  %vm662_vm0 = vcmp.ge.f32.partialorder %v1765_v1, 1.0  ;;  %v1301_v9 = vsel %vm663_vm13, 1.0, %v1490_v61  ;;  %v1020_v63 = vpop.permute.xlu0 %1019 }
 0x108   : > { %v651_v15 = vadd.f32 %v643_v4, %v631_v6  ;;  %v634_v16 = vadd.f32 %v1383_v11, %v1738_v14  ;;  %v625_v19 = vpop.f32.mrb[7].mxu0  ;;  %680 = vst [vmem:[#allocation3 + $0x18] sm:$0xff] %v672_v13  ;;  %v670_v21 = vsel %vm662_vm0, 0.0, %v1765_v1 }
 0x109   : > { %v649_v2 = vadd.f32 %v641_v8, %v623_v10  ;;  %v626_v22 = vadd.f32 %v625_v19, %v1728_v0  ;;  %678 = vst [vmem:[#allocation3 + $0x8] sm:$0xff] %v670_v21  ;;  %v1461_v8 = vld [vmem:[%s1838_s2] sm:$0xff]   ;;  %v1300_v21 = vsel %vm662_vm0, 1.0, %v1490_v61 }
 0x10a   : > { %v659_v23 = vmul.f32 0.5, %v651_v15  ;;  %v652_v18 = vadd.f32 %v644_v12, %v634_v16  ;;  %v1299_v12 = vsel %vm661_vm14, 1.0, %v1490_v61  ;;  %v1302_v16 = vsel %vm664_vm15, 1.0, %v1490_v61 }
 0x10b   : > { %v657_v17 = vmul.f32 0.5, %v649_v2  ;;  %v650_v25 = vadd.f32 %v642_v20, %v626_v22  ;;  %v1030_v1 = vpop.permute.xlu0 %1029 }
 0x10c   : > { %vm667_vm2 = vcmp.ge.f32.partialorder %v659_v23, 1.0  ;;  %v660_v26 = vmul.f32 0.5, %v652_v18 }
 0x10d   : > { %v675_v27 = vsel %vm667_vm2, 0.0, %v659_v23  ;;  %v1305_v14 = vsel %vm667_vm2, 1.0, %v1490_v61  ;;  %v658_v29 = vmul.f32 0.5, %v650_v25  ;;  %vm665_vm3 = vcmp.ge.f32.partialorder %v657_v17, 1.0 }
 0x10e   : > { %683 = vst [vmem:[#allocation3 + $0x30] sm:$0xff] %v675_v27  ;;  %vm668_vm4 = vcmp.ge.f32.partialorder %v660_v26, 1.0  ;;  %v673_v30 = vsel %vm665_vm3, 0.0, %v657_v17  ;;  %v1303_v31 = vsel %vm665_vm3, 1.0, %v1490_v61  ;;  %v791_v35 = vmul.f32 %v1753_v38, %v1305_v14 }
 0x10f   : > { %v676_v32 = vsel %vm668_vm4, 0.0, %v660_v26  ;;  %v1306_v0 = vsel %vm668_vm4, 1.0, %v1490_v61  ;;  %vm666_vm5 = vcmp.ge.f32.partialorder %v658_v29, 1.0  ;;  %681 = vst [vmem:[#allocation3 + $0x20] sm:$0xff] %v673_v30  ;;  %v789_v39 = vmul.f32 %v1744_v28, %v1303_v31 }
 0x110   : > { %684 = vst [vmem:[#allocation3 + $0x38] sm:$0xff] %v676_v32  ;;  %v674_v33 = vsel %vm666_vm5, 0.0, %v658_v29  ;;  %v1304_v34 = vsel %vm666_vm5, 1.0, %v1490_v61  ;;  %v792_v37 = vmul.f32 %v1750_v36, %v1306_v0 }
 0x111   : > { %682 = vst [vmem:[#allocation3 + $0x28] sm:$0xff] %v674_v33  ;;  %v790_v40 = vmul.f32 %v1741_v24, %v1304_v34 }
 0x112   : > { %v794_v41 = vpack.c.bf16 %v792_v37, %v791_v35 }
 0x113   : > { %v793_v42 = vpack.c.bf16 %v790_v40, %v789_v39 }
 0x115   : > { %1400 = vmatprep.mubr.bf16.mxu1 %v793_v42 }
 0x116   : > { %1401 = vmatmul.mubr.bf16.vlgmr.msra.gmra.mrb[0].mxu1 %v794_v41 }
 0x1e9   : > { %v1402_v45 = vpop.f32.mrb[0].mxu1 }
 0x1ea   : > { %v914_v47 = vadd.f32 %v1402_v45, %v910_v43  ;;  %v893_v48 = vpop.f32.mrb[1].mxu1 }
 0x1eb   : > { %v912_v50 = vadd.f32 %v908_v44, %v893_v48  ;;  %v1403_v38 = vpop.f32.mrb[2].mxu1 }
 0x1ec   : > { %v918_v51 = vmul.f32 0.5, %v914_v47  ;;  %v915_v36 = vadd.f32 %v1403_v38, %v911_v46  ;;  %v896_v52 = vpop.f32.mrb[3].mxu1 }
 0x1ed   : > { %v916_v28 = vmul.f32 0.5, %v912_v50  ;;  %v913_v53 = vadd.f32 %v909_v49, %v896_v52 }
 0x1ee   : > { %vm922_vm7 = vcmp.ge.f32.partialorder %v918_v51, 0.5  ;;  %v919_v24 = vmul.f32 0.5, %v915_v36 }
 0x1ef   : > { %v926_v54 = vsel %vm922_vm7, 0.0, %v918_v51  ;;  %vm920_vm8 = vcmp.ge.f32.partialorder %v916_v28, 0.5  ;;  %v917_v55 = vmul.f32 0.5, %v913_v53  ;;  %v1321_v57 = vsel %vm922_vm7, 1.0, %v1490_v61 }
 0x1f0   : > { %931 = vst.msk [vmem:[#allocation5 + $0x10] sm:$0xff] %vm928_vm6, %v926_v54  ;;  %v924_v56 = vsel %vm920_vm8, 0.0, %v916_v28  ;;  %vm923_vm9 = vcmp.ge.f32.partialorder %v919_v24, 0.5  ;;  %v1319_v3 = vsel %vm920_vm8, 1.0, %v1490_v61 }
 0x1f1   : > { %929 = vst.msk [vmem:[#allocation5] sm:$0xff] %vm928_vm6, %v924_v56  ;;  %v927_v59 = vsel %vm923_vm9, 0.0, %v919_v24  ;;  %v1322_v62 = vsel %vm923_vm9, 1.0, %v1490_v61  ;;  %vm921_vm10 = vcmp.ge.f32.partialorder %v917_v55, 0.5 }
 0x1f2   : > { %932 = vst.msk [vmem:[#allocation5 + $0x18] sm:$0xff] %vm928_vm6, %v927_v59  ;;  %v942_v4 = vpack.c.bf16 %v1322_v62, %v1321_v57  ;;  %v925_v5 = vsel %vm921_vm10, 0.0, %v917_v55  ;;  %v1320_v6 = vsel %vm921_vm10, 1.0, %v1490_v61  ;;  %v1025_v61 = vpop.permute.xlu1 %1024 }
 0x1f3   : > { %930 = vst.msk [vmem:[#allocation5 + $0x8] sm:$0xff] %vm928_vm6, %v925_v5  ;;  %v941_v7 = vpack.c.bf16 %v1320_v6, %v1319_v3 }
 0x1f5   : > { %1406 = vmatprep.mubr.msk.bf16.mxu0 %vm928_vm6, %v941_v7 }
 0x1f6   : > { %1407 = vmatmul.mubr.msk.bf16.vlgmr.msra.gmra.mrb[8].mxu0 %vm928_vm6, %v942_v4  ;;  %v1035_v26 = vpop.permute.xlu1 %1034 }
 0x1f7   : > { %1414 = vmatprep.mubr.msk.bf16.mxu0 %vm559_vm1, %v1461_v8 }
 0x2c9   : > { %v1408_v10 = vpop.f32.mrb[8].mxu0 }
 0x2ca   : > { %v1005_v11 = vmul.f32 %v1408_v10, %v1301_v9  ;;  %v988_v13 = vpop.f32.mrb[9].mxu0 }
 0x2cb   : > { %v1003_v15 = vmul.f32 %v1299_v12, %v988_v13  ;;  %v1409_v19 = vpop.f32.mrb[10].mxu0 }
 0x2cc   : > { %v1006_v20 = vmul.f32 %v1409_v19, %v1302_v16  ;;  %v991_v58 = vpop.f32.mrb[11].mxu0 }
 0x2cd   : > { %v1004_v2 = vmul.f32 %v1300_v21, %v991_v58 }
 0x2ce   : > { %v1008_v22 = vpack.c.bf16 %v1006_v20, %v1005_v11 }
 0x2cf   : > { %v1007_v23 = vpack.c.bf16 %v1004_v2, %v1003_v15 }
 0x2d1   : > { %1410 = vmatprep.subr.bf16.mxu0 %v1007_v23 }
 0x2d2   : > { %1411 = vmatpush3.bf16.msra.mxu0 %v1007_v23 }
 0x2d3   : > { %1412 = vmatprep.subr.bf16.mxu0 %v1008_v22 }
 0x2d6   : > { %1413 = vmatpush3.bf16.msra.mxu0 %v1008_v22 }
 0x2d9   : > { %1415 = vmatmul.mubr.msk.bf16.vlgmr.msra.gmra.mrb[12].mxu0 %vm559_vm1, %v1462_v60 }
 0x3ac   : > { %v1416_v18 = vpop.f32.mrb[12].mxu0 }
 0x3ad   : > { %v1096_v17 = vadd.f32 %v1416_v18, %v1030_v1  ;;  %v1087_v25 = vpop.f32.mrb[13].mxu0 }
 0x3ae   : > { %v1088_v27 = vadd.f32 %v1087_v25, %v1020_v63  ;;  %v1417_v14 = vpop.f32.mrb[14].mxu0 }
 0x3af   : > { %1104 = vst [vmem:[%s1572_s25 + $0x10] sm:$0xff] %v1096_v17  ;;  %v1099_v29 = vadd.f32 %v1417_v14, %v1035_v26  ;;  %v1090_v30 = vpop.f32.mrb[15].mxu0 }
 0x3b0   : > { %1102 = vst [vmem:[%s1572_s25] sm:$0xff] %v1088_v27  ;;  %v1091_v31 = vadd.f32 %v1090_v30, %v1025_v61 }
 0x3b1   : > { %1105 = vst [vmem:[%s1572_s25 + $0x18] sm:$0xff] %v1099_v29 }
 0x3b2   : > { %1103 = vst [vmem:[%s1572_s25 + $0x8] sm:$0xff] %v1091_v31 }
 0x3b3 PF: > { %s21_s15 = sadd.s32 1, %s1485_s15   ;;  %s1847_s13 = smov %s1481_s14 }
 0x3b4   : > { %p18_p6 = scmp.ge.s32.totalorder %s21_s15, 6   ;;  %s1848_s14 = smov %s1850_s16 }
 0x3b6   :  { %20 = sbr.rel (!%p18_p6) target bundleno = 2 (0x2), region = 102 }

</bundles_post_ra>
